<compile_context>
chip_gen: v7x
topology: tpu7x:2x2x1
jax: 0.10.0
libtpu: 0.0.40
codegen_flags: <defaults>
</compile_context>

<pallas_src>
import jax
import jax.numpy as jnp
from jax.experimental import pallas as pl
from jax.experimental.pallas import tpu as pltpu


def ae_kernel(x_ref, w_enc_ref, b_enc_ref, w_dec_ref, b_dec_ref, o_ref):
    # Encoder linear: x[B, d0] @ w_enc_t[d0, d1] + b_enc[1, d1]
    enc = jnp.dot(x_ref[...], w_enc_ref[...],
                  preferred_element_type=jnp.float32) + b_enc_ref[...]

    # Softmax over dim=0 (the batch axis), matching nn.Softmax(dim=0).
    m = jnp.max(enc, axis=0, keepdims=True)
    e = jnp.exp(enc - m)
    act = e / jnp.sum(e, axis=0, keepdims=True)

    # Decoder linear: act[B, d1] @ w_dec_t[d1, d2p] + b_dec[1, d2p]
    # (d2p is a lane-dense multiple of 128; padded columns are zero and
    # are sliced off in the wrapper.)
    dec = jnp.dot(act, w_dec_ref[...],
                  preferred_element_type=jnp.float32) + b_dec_ref[...]

    o_ref[...] = dec.astype(o_ref.dtype)


def prepare_params(w_enc, b_enc, w_dec, b_dec):
    """One-time parameter prep (outside the hot path).

    Inputs in native PyTorch nn.Linear layout:
      w_enc: [dim_1, dim_0], b_enc: [dim_1]
      w_dec: [dim_2, dim_1], b_dec: [dim_2]
    Produces transposed [in, out] weights, lane-padded decoder output dim.
    """
    d1, d0 = w_enc.shape
    d2 = w_dec.shape[0]
    d2p = ((d2 + 127) // 128) * 128

    w_enc_t = jnp.asarray(w_enc).T                    # [d0, d1]
    b_enc_r = jnp.asarray(b_enc).reshape(1, d1)       # [1, d1]

    w_dec_a = jnp.asarray(w_dec)
    b_dec_a = jnp.asarray(b_dec)
    if d2p != d2:
        w_dec_a = jnp.pad(w_dec_a, ((0, d2p - d2), (0, 0)))
        b_dec_a = jnp.pad(b_dec_a, ((0, d2p - d2),))
    w_dec_t = w_dec_a.T                               # [d1, d2p]
    b_dec_r = b_dec_a.reshape(1, d2p)                 # [1, d2p]

    return dict(w_enc_t=w_enc_t, b_enc=b_enc_r,
                w_dec_t=w_dec_t, b_dec=b_dec_r,
                d0=d0, d1=d1, d2=d2, d2p=d2p)


def make_ae_forward(params):
    """Returns a jitted forward. Accepts features of shape [B, dim_0]
    (single instance, matches the PyTorch module) or [N, B, dim_0]
    (N independent instances batched into one gridded pallas_call)."""
    w_enc_t = params["w_enc_t"]
    b_enc = params["b_enc"]
    w_dec_t = params["w_dec_t"]
    b_dec = params["b_dec"]
    d0, d1, d2, d2p = params["d0"], params["d1"], params["d2"], params["d2p"]

    @jax.jit
    def forward(features):
        single = features.ndim == 2
        x = features[None] if single else features
        N, B, _ = x.shape

        out = pl.pallas_call(
            ae_kernel,
            out_shape=jax.ShapeDtypeStruct((N, B, d2p), x.dtype),
            grid=(N,),
            in_specs=[
                # One instance per grid step; full batch B stays in-block so
                # the dim=0 softmax normalization is never split.
                pl.BlockSpec((pl.Squeezed(), B, d0), lambda i: (i, 0, 0)),
                # Weights / biases: same block every step -> VMEM-resident.
                pl.BlockSpec((d0, d1), lambda i: (0, 0)),
                pl.BlockSpec((1, d1), lambda i: (0, 0)),
                pl.BlockSpec((d1, d2p), lambda i: (0, 0)),
                pl.BlockSpec((1, d2p), lambda i: (0, 0)),
            ],
            out_specs=pl.BlockSpec((pl.Squeezed(), B, d2p), lambda i: (i, 0, 0)),
            compiler_params=pltpu.CompilerParams(
                dimension_semantics=("parallel",)),
        )(x, w_enc_t, b_enc, w_dec_t, b_dec)

        if d2p != d2:
            out = out[..., :d2]
        return out[0] if single else out

    return forward


def reference_forward(features, w_enc, b_enc, w_dec, b_dec):
    """Pure-JAX reference matching the PyTorch module (per instance)."""
    enc = features @ w_enc.T + b_enc
    act = jax.nn.softmax(enc, axis=-2)   # softmax over the batch axis
    return act @ w_dec.T + b_dec


if __name__ == "__main__":
    # Small shapes consistent with the module: dim_0=32, dim_1=16,
    # dim_2=200 (a multiple of 100, so self.dim = 2), batch=8.
    B, dim_0, dim_1, dim_2 = 8, 32, 16, 200
    N = 4  # independent instances for the batched path

    key = jax.random.PRNGKey(0)
    k_x, k_xb, k_we, k_be, k_wd, k_bd = jax.random.split(key, 6)

    features = jax.random.normal(k_x, (B, dim_0), dtype=jnp.float32)
    features_batched = jax.random.normal(k_xb, (N, B, dim_0), dtype=jnp.float32)

    # Deterministic synthetic parameters (PyTorch nn.Linear layout: [out, in]).
    w_enc = jax.random.normal(k_we, (dim_1, dim_0), dtype=jnp.float32) * 0.1
    b_enc = jax.random.normal(k_be, (dim_1,), dtype=jnp.float32) * 0.1
    w_dec = jax.random.normal(k_wd, (dim_2, dim_1), dtype=jnp.float32) * 0.1
    b_dec = jax.random.normal(k_bd, (dim_2,), dtype=jnp.float32) * 0.1

    params = prepare_params(w_enc, b_enc, w_dec, b_dec)
    ae_forward = make_ae_forward(params)

    # Single-instance path (exact PyTorch forward semantics).
    out = jax.block_until_ready(ae_forward(features))
    ref = reference_forward(features, w_enc, b_enc, w_dec, b_dec)
    assert out.shape == (B, dim_2)
    assert jnp.allclose(out, ref, atol=1e-4, rtol=1e-4), "single-instance mismatch"

    # Batched independent-instance path (one gridded pallas_call).
    out_b = jax.block_until_ready(ae_forward(features_batched))
    ref_b = reference_forward(features_batched, w_enc, b_enc, w_dec, b_dec)
    assert out_b.shape == (N, B, dim_2)
    assert jnp.allclose(out_b, ref_b, atol=1e-4, rtol=1e-4), "batched mismatch"

    print("KERNEL_OK")
</pallas_src>

<mosaic_0001>
module attributes {stable_mosaic.version = 11 : i64} {
  func.func @ae_kernel(%arg0: i32, %arg1: memref<1x8x32xf32, #tpu.memory_space<vmem>>, %arg2: memref<32x16xf32, #tpu.memory_space<vmem>>, %arg3: memref<1x16xf32, #tpu.memory_space<vmem>>, %arg4: memref<16x256xf32, #tpu.memory_space<vmem>>, %arg5: memref<1x256xf32, #tpu.memory_space<vmem>>, %arg6: memref<1x8x256xf32, #tpu.memory_space<vmem>>) attributes {dimension_semantics = [#tpu.dimension_semantics<parallel>], iteration_bounds = array<i64: 1>, scalar_prefetch = 0 : i64, scratch_operands = 0 : i64, tpu.core_type = #tpu.core_type<tc>, window_params = [{transform_indices = @transform_0, window_bounds = array<i64: 1, 8, 32>}, {pipeline_mode = #tpu.pipeline_mode<synchronous>, transform_indices = @transform_1, window_bounds = array<i64: 32, 16>}, {pipeline_mode = #tpu.pipeline_mode<synchronous>, transform_indices = @transform_2, window_bounds = array<i64: 1, 16>}, {pipeline_mode = #tpu.pipeline_mode<synchronous>, transform_indices = @transform_3, window_bounds = array<i64: 16, 256>}, {pipeline_mode = #tpu.pipeline_mode<synchronous>, transform_indices = @transform_4, window_bounds = array<i64: 1, 256>}, {transform_indices = @transform_5, window_bounds = array<i64: 1, 8, 256>}]} {
    %c0 = arith.constant 0 : index
    %c0_0 = arith.constant 0 : index
    %c0_1 = arith.constant 0 : index
    %0 = vector.load %arg1[%c0, %c0_0, %c0_1] : memref<1x8x32xf32, #tpu.memory_space<vmem>>, vector<1x8x32xf32>
    %1 = vector.shape_cast %0 : vector<1x8x32xf32> to vector<8x32xf32>
    %c0_2 = arith.constant 0 : index
    %c0_3 = arith.constant 0 : index
    %2 = vector.load %arg2[%c0_2, %c0_3] : memref<32x16xf32, #tpu.memory_space<vmem>>, vector<32x16xf32>
    %cst = arith.constant dense<0.000000e+00> : vector<8x16xf32>
    %3 = tpu.matmul %1, %2, %cst {dimension_numbers = #tpu.dot_dimension_numbers<[1], [0], [0], [1], [0, 0, 1, 1], [], []>} : vector<8x32xf32>, vector<32x16xf32>, vector<8x16xf32> -> vector<8x16xf32>
    %c0_4 = arith.constant 0 : index
    %c0_5 = arith.constant 0 : index
    %4 = vector.load %arg3[%c0_4, %c0_5] : memref<1x16xf32, #tpu.memory_space<vmem>>, vector<1x16xf32>
    %5 = vector.broadcast %4 : vector<1x16xf32> to vector<8x16xf32>
    %6 = arith.addf %3, %5 : vector<8x16xf32>
    %cst_6 = arith.constant dense<0xFF800000> : vector<16xf32>
    %7 = vector.multi_reduction <maximumf>, %6, %cst_6 [0] : vector<8x16xf32> to vector<16xf32>
    %8 = vector.shape_cast %7 : vector<16xf32> to vector<1x16xf32>
    %9 = vector.broadcast %8 : vector<1x16xf32> to vector<8x16xf32>
    %10 = arith.subf %6, %9 : vector<8x16xf32>
    %11 = math.exp %10 : vector<8x16xf32>
    %cst_7 = arith.constant dense<0.000000e+00> : vector<16xf32>
    %12 = vector.multi_reduction <add>, %11, %cst_7 [0] : vector<8x16xf32> to vector<16xf32>
    %13 = vector.shape_cast %12 : vector<16xf32> to vector<1x16xf32>
    %14 = vector.broadcast %13 : vector<1x16xf32> to vector<8x16xf32>
    %15 = arith.divf %11, %14 : vector<8x16xf32>
    %c0_8 = arith.constant 0 : index
    %c0_9 = arith.constant 0 : index
    %16 = vector.load %arg4[%c0_8, %c0_9] : memref<16x256xf32, #tpu.memory_space<vmem>>, vector<16x256xf32>
    %cst_10 = arith.constant dense<0.000000e+00> : vector<8x256xf32>
    %17 = tpu.matmul %15, %16, %cst_10 {dimension_numbers = #tpu.dot_dimension_numbers<[1], [0], [0], [1], [0, 0, 1, 1], [], []>} : vector<8x16xf32>, vector<16x256xf32>, vector<8x256xf32> -> vector<8x256xf32>
    %c0_11 = arith.constant 0 : index
    %c0_12 = arith.constant 0 : index
    %18 = vector.load %arg5[%c0_11, %c0_12] : memref<1x256xf32, #tpu.memory_space<vmem>>, vector<1x256xf32>
    %19 = vector.broadcast %18 : vector<1x256xf32> to vector<8x256xf32>
    %20 = arith.addf %17, %19 : vector<8x256xf32>
    %c0_13 = arith.constant 0 : index
    %c0_14 = arith.constant 0 : index
    %c0_15 = arith.constant 0 : index
    %21 = vector.load %arg6[%c0_13, %c0_14, %c0_15] : memref<1x8x256xf32, #tpu.memory_space<vmem>>, vector<1x8x256xf32>
    %22 = vector.shape_cast %21 : vector<1x8x256xf32> to vector<8x256xf32>
    %23 = vector.shape_cast %20 : vector<8x256xf32> to vector<1x8x256xf32>
    tpu.vector_store %arg6[%c0_13, %c0_14, %c0_15], %23 {strides = array<i32>} : memref<1x8x256xf32, #tpu.memory_space<vmem>>, vector<1x8x256xf32>,
    return
  }
  func.func @transform_0(%arg0: i32) -> (i32, i32, i32) {
    %c0_i32 = arith.constant 0 : i32
    %c0_i32_0 = arith.constant 0 : i32
    %c0_i32_1 = arith.constant 0 : i32
    return %arg0, %c0_i32, %c0_i32_0 : i32, i32, i32
  }
  func.func @transform_1(%arg0: i32) -> (i32, i32) {
    %c0_i32 = arith.constant 0 : i32
    %c0_i32_0 = arith.constant 0 : i32
    %c0_i32_1 = arith.constant 0 : i32
    return %c0_i32, %c0_i32_0 : i32, i32
  }
  func.func @transform_2(%arg0: i32) -> (i32, i32) {
    %c0_i32 = arith.constant 0 : i32
    %c0_i32_0 = arith.constant 0 : i32
    %c0_i32_1 = arith.constant 0 : i32
    return %c0_i32, %c0_i32_0 : i32, i32
  }
  func.func @transform_3(%arg0: i32) -> (i32, i32) {
    %c0_i32 = arith.constant 0 : i32
    %c0_i32_0 = arith.constant 0 : i32
    %c0_i32_1 = arith.constant 0 : i32
    return %c0_i32, %c0_i32_0 : i32, i32
  }
  func.func @transform_4(%arg0: i32) -> (i32, i32) {
    %c0_i32 = arith.constant 0 : i32
    %c0_i32_0 = arith.constant 0 : i32
    %c0_i32_1 = arith.constant 0 : i32
    return %c0_i32, %c0_i32_0 : i32, i32
  }
  func.func @transform_5(%arg0: i32) -> (i32, i32, i32) {
    %c0_i32 = arith.constant 0 : i32
    %c0_i32_0 = arith.constant 0 : i32
    %c0_i32_1 = arith.constant 0 : i32
    return %arg0, %c0_i32, %c0_i32_0 : i32, i32, i32
  }
}

</mosaic_0001>

<bundles_post_ra>
// kernel: forward.1
= control target key start
LH: loop header
LB: loop body
LE: loop exit
PB: predicated region body
PF: predicated region fallthrough
CT: control target
= control target key end

     0   :  { %10 = vsyncpa [#allocation3], 0  ;;  %s467_s0 = inlined_call_operand.hbm [shape: f32[1,8,32], index: 0, kind: input, shape index: {}]   ;;  %s468_s1 = inlined_call_operand.hbm [shape: f32[32,16], index: 1, kind: input, shape index: {}]   ;;  %s469_s2 = inlined_call_operand.vmem [shape: f32[1,16], index: 2, kind: input, shape index: {}]   ;;  %s470_s3 = inlined_call_operand.hbm [shape: f32[16,256], index: 3, kind: input, shape index: {}]   ;;  %s471_s4 = inlined_call_operand.vmem [shape: f32[1,256], index: 4, kind: input, shape index: {}]   ;;  %s472_s5 = inlined_call_operand.vmem [shape: f32[1,8,256], index: 5, kind: output, shape index: {}]  }
   0x1   :  { %11 = vsyncpa [#allocation5], 0  ;;  %s376_s18 = smov [#allocation4]   ;;  %s306_s22 = scalar_lea.hbm %s468_s1, 512 }
   0x2   :  { %s27_s19 = sshll.u32 %s376_s18, 4  ;;  %p307_p0 = scmp.ne.s32.totalorder %s468_s1, %s306_s22  ;;  %s28_s19 = int_to_ptr.vmem [resolvable:$true] %s27_s19 }
   0x3   :  { %p310_p1 = scmp.lt.u32.totalorder %s306_s22, %s468_s1 }
   0x5   :  { %p312_p2 = pnand %p310_p1, %p307_p0 }
   0x7   :  { %315 = shalt.err (!%p312_p2)
}
   0x8   :  { %s316_s27 = scalar_lea.vmem %s28_s19, 512  ;;  %p321_p4 = scmp.lt.s32.totalorder %s28_s19, %s28_s19 }
   0x9   :  { %p317_p3 = scmp.ne.s32.totalorder %s28_s19, %s316_s27  ;;  %p322_p5 = scmp.lt.s32.totalorder %s316_s27, %s316_s27 }
   0xb   :  { %p323_p6 = por %p322_p5, %p321_p4 }
   0xd   :  { %p324_p7 = pnand %p323_p6, %p317_p3 }
   0xf   :  { %327 = shalt.err (!%p324_p7)
}
  0x10   :  { %s377_s28 = smov 128   ;;  %s378_s29 = smov 8  }
  0x11   :  { %33 = dma.hbm_to_vmem [thread:$0]  %s468_s1, 512, %s28_s19, [#allocation5], %s377_s28, %s377_s28, %s378_s29  }
  0x12   :  { %s379_s7 = smov [#allocation2]   ;;  %s380_s9 = smov [#allocation6]  }
  0x13   :  { %s18_s8 = sshll.u32 %s379_s7, 4  ;;  %s41_s10 = sshll.u32 %s380_s9, 4  ;;  %s19_s8 = int_to_ptr.vmem [resolvable:$true] %s18_s8  ;;  %s42_s10 = int_to_ptr.vmem [resolvable:$true] %s41_s10 }
  0x14   :  { %s328_s13 = scalar_lea.hbm %s467_s0, 128 }
  0x15   :  { %p329_p8 = scmp.ne.s32.totalorder %s467_s0, %s328_s13  ;;  %p332_p9 = scmp.lt.u32.totalorder %s328_s13, %s467_s0 }
  0x17   :  { %p334_p10 = pnand %p332_p9, %p329_p8 }
  0x19   :  { %337 = shalt.err (!%p334_p10)
}
  0x1a   :  { %s338_s1 = scalar_lea.vmem %s19_s8, 128  ;;  %p343_p12 = scmp.lt.s32.totalorder %s19_s8, %s19_s8 }
  0x1b   :  { %p339_p11 = scmp.ne.s32.totalorder %s19_s8, %s338_s1  ;;  %p344_p13 = scmp.lt.s32.totalorder %s338_s1, %s338_s1 }
  0x1d   :  { %p345_p0 = por %p344_p13, %p343_p12 }
  0x1f   :  { %p346_p1 = pnand %p345_p0, %p339_p11 }
  0x21   :  { %349 = shalt.err (!%p346_p1)
}
  0x22   :  { %21 = dma.hbm_to_vmem [thread:$0]  %s467_s0, 128, %s19_s8, [#allocation3]  }
  0x23   :  { %s350_s22 = scalar_lea.hbm %s470_s3, 512 }
  0x24   :  { %p351_p2 = scmp.ne.s32.totalorder %s470_s3, %s350_s22  ;;  %p354_p3 = scmp.lt.u32.totalorder %s350_s22, %s470_s3 }
  0x26   :  { %p356_p4 = pnand %p354_p3, %p351_p2 }
  0x28   :  { %359 = shalt.err (!%p356_p4)
}
  0x29   :  { %s360_s27 = scalar_lea.vmem %s42_s10, 512  ;;  %p365_p6 = scmp.lt.s32.totalorder %s42_s10, %s42_s10 }
  0x2a   :  { %p361_p5 = scmp.ne.s32.totalorder %s42_s10, %s360_s27  ;;  %p366_p7 = scmp.lt.s32.totalorder %s360_s27, %s360_s27 }
  0x2c   :  { %p367_p8 = por %p366_p7, %p365_p6 }
  0x2e   :  { %p368_p9 = pnand %p367_p8, %p361_p5 }
  0x30   :  { %371 = shalt.err (!%p368_p9)
}
  0x31   :  { %s381_s0 = smov 256   ;;  %s382_s28 = smov 16  }
  0x32   :  { %47 = dma.hbm_to_vmem [thread:$0]  %s470_s3, 512, %s42_s10, [#allocation5], %s381_s0, %s381_s0, %s382_s28  }
  0x33   :  { %372 = dma.done.wait [#allocation3], 128  }
  0x34   :  { %373 = vsyncadd [#allocation3], 4294967168 }
  0x35   :  { %374 = dma.done.wait [#allocation5], 1024  }
  0x36   :  { %375 = vsyncadd [#allocation5], 4294966272  ;;  %v383_v0 = vmov 0.0|0.0   ;;  %vm384_vm0 = vmmov 0   ;;  %v385_v1 = vmov 0.0   ;;  %v60_v2 = vld [vmem:[#allocation4] sm:$0xff]  ;;  %v171_v38 = vlaneseq }
  0x37   :  { %282 = vmatprep.subr.bf16.mxu0 %v383_v0  ;;  %279 = vmatprep.mubr.msk.f32.mxu0 %vm384_vm0, %v385_v1  ;;  %v61_v3 = vld [vmem:[#allocation4 + $0x8] sm:$0xff]  ;;  %v62_v4 = vld [vmem:[#allocation4 + $0x10] sm:$0xff]  ;;  %v63_v6 = vld [vmem:[#allocation4 + $0x18] sm:$0xff]  ;;  %vm71_vm1 = vcmask 261120   ;;  %vm145_vm2 = vcmask 130048  }
  0x38   :  { %248 = vmatprep.mubr.f32.mxu1 %v385_v1  ;;  %v283_v5 = vpack.c.bf16 %v61_v3, %v60_v2  ;;  %v286_v7 = vpack.c.bf16 %v63_v6, %v62_v4  ;;  %v59_v8 = vld [vmem:[#allocation2] sm:$0xff]  ;;  %v166_v9 = vld [vmem:[#allocation6 + $0x8] sm:$0xff]  ;;  %v165_v11 = vld [vmem:[#allocation6] sm:$0xff]  ;;  %v172_v39 = vshrl.u32 %v171_v38, 7 }
  0x39   :  { %v168_v10 = vld [vmem:[#allocation6 + $0x18] sm:$0xff]  ;;  %v167_v13 = vld [vmem:[#allocation6 + $0x10] sm:$0xff] }
  0x3a   :  { %284 = vmatpush3.bf16.msra.mxu0 %v283_v5  ;;  %v288_v12 = vpack.c.bf16 %v168_v10, %v166_v9  ;;  %v290_v14 = vpack.c.bf16 %v167_v13, %v165_v11  ;;  %v263_v15 = vld [vmem:[%s469_s2] ss:$0 sm:$0xff]  ;;  %v173_v40 = vsub.s32 0, %v172_v39  ;;  %v177_v42 = vsub.s32 1, %v172_v39 }
  0x3b   :  { %285 = vmatprep.subr.bf16.mxu0 %v383_v0  ;;  %v169_v41 = vld [vmem:[%s471_s4] sm:$0x3] }
  0x3c   :  { %289 = vmatprep.subr.bf16.mxu1 %v288_v12  ;;  %v174_v43 = vrot.slane %v169_v41, %v173_v40  ;;  %v178_v44 = vrot.slane %v169_v41, %v177_v42 }
  0x3d   :  { %291 = vmatpush1.bf16.msra.mxu1 %v290_v14 }
  0x3e   :  { %287 = vmatpush3.bf16.msra.mxu0 %v286_v7 }
  0x41   :  { %280 = vmatmul.mubr.msk.f32.vlgmr.msra.gmra.mrb[0].mxu0 %vm71_vm1, %v59_v8 }
 0x114   :  { %v141_v16 = vpop.f32.mrb[0].mxu0 }
 0x115   :  { %v142_v17 = vadd.f32 %v263_v15, %v141_v16  ;;  %v281_v18 = vpop.f32.mrb[1].mxu0 }
 0x117   :  { %v146_v19 = vsel %vm145_vm2, %v142_v17, -inf }
 0x118   :  { %v147_v20 = vrot.slane %v146_v19, 4 }
 0x11a   :  { %v148_v21 = vmax.f32 %v146_v19, %v147_v20 }
 0x11c   :  { %v149_v22 = vrot.slane %v148_v21, 2 }
 0x11e   :  { %v150_v23 = vmax.f32 %v148_v21, %v149_v22 }
 0x120   :  { %v151_v24 = vrot.slane %v150_v23, 1 }
 0x122   :  { %v152_v25 = vmax.f32 %v150_v23, %v151_v24 }
 0x124   :  { %v153_v26 = vsub.f32 %v142_v17, %v152_v25 }
 0x126   :  { %v154_v27 = vmul.f32 1.442695, %v153_v26 }
 0x128   :  { %302 = vpow2.f32 %v154_v27 }
 0x132   :  { %v303_v28 = vpop.eup %302 }
 0x133   :  { %v156_v29 = vsel %vm145_vm2, %v303_v28, 0.0 }
 0x134   :  { %v157_v30 = vrot.slane %v156_v29, 4 }
 0x136   :  { %v158_v31 = vadd.f32 %v157_v30, %v156_v29 }
 0x138   :  { %v159_v32 = vrot.slane %v158_v31, 2 }
 0x13a   :  { %v160_v33 = vadd.f32 %v159_v32, %v158_v31 }
 0x13c   :  { %v161_v34 = vrot.slane %v160_v33, 1 }
 0x13e   :  { %v162_v35 = vadd.f32 %v161_v34, %v160_v33 }
 0x140   :  { %304 = vrcp.f32 %v162_v35 }
 0x14a   :  { %v305_v36 = vpop.eup %304 }
 0x14b   :  { %v164_v37 = vmul.f32 %v305_v36, %v303_v28 }
 0x14d   :  { %265 = vmatmul.mubr.msk.f32.vlgmr.msra.gmra.mrb[0].mxu1 %vm145_vm2, %v164_v37 }
 0x220   :  { %v250_v45 = vpop.f32.mrb[0].mxu1 }
 0x221   :  { %v251_v46 = vadd.f32 %v250_v45, %v174_v43  ;;  %v252_v47 = vpop.f32.mrb[1].mxu1 }
 0x222   :  { %v253_v48 = vadd.f32 %v252_v47, %v178_v44 }
 0x223   :  { %255 = vst [vmem:[%s472_s5] sm:$0xff] %v251_v46 }
 0x224   :  { %256 = vst [vmem:[%s472_s5 + $0x8] sm:$0xff] %v253_v48 }
 0x225   :  { %261 = vsyncpa [#allocation3], 1 }
 0x226   :  { %262 = vsyncpa [#allocation5], 1 }

</bundles_post_ra>
